<compile_context>
chip_gen: v7x
topology: tpu7x:2x2x1
jax: 0.10.0
libtpu: 0.0.40
codegen_flags: <defaults>
</compile_context>

<pallas_src>
import functools
import math

import numpy as np

import jax
import jax.numpy as jnp
from jax.experimental import pallas as pl
from jax.experimental.pallas import tpu as pltpu


# ----------------------------------------------------------------------------
# tiling helpers
# ----------------------------------------------------------------------------
def _row_tile(M, target=512):
    """Largest row tile tm with tm % 8 == 0, M % tm == 0, tm <= target,
    preferring >= 2 grid steps (so v7x can use both TensorCores)."""
    cands = [t for t in range(8, min(M, target) + 1, 8) if M % t == 0]
    if not cands:
        return M                      # tm == full M is always legal
    two_step = [t for t in cands if M // t >= 2]
    return max(two_step) if two_step else max(cands)


def _seq_tile(n, target=64):
    """Sequence-group tile: divisor of n, <= target, preferring >= 2 grid steps."""
    if n <= 1:
        return max(n, 1)
    cap = min(target, max(1, n // 2))
    for t in range(cap, 0, -1):
        if n % t == 0:
            return t
    return n


# ----------------------------------------------------------------------------
# Pallas kernels: row-tiled Linear and LayerNorm (for embeddings / fusion / LNf)
# ----------------------------------------------------------------------------
def _linear_kernel(x_ref, w_ref, b_ref, o_ref, *, act):
    y = jnp.dot(x_ref[...], w_ref[...],
                preferred_element_type=jnp.float32) + b_ref[...]
    if act == "gelu":
        # TODO(synk): PyTorch nn.GELU defaults to the exact erf form; the tanh
        # approximation is used for guaranteed Mosaic lowering support.
        y = jax.nn.gelu(y, approximate=True)
    o_ref[...] = y.astype(o_ref.dtype)


def pallas_linear(x, w, b, act="none"):
    """x: [M, K], w: [K, N], b: [N] -> [M, N]; row-tiled, parallel grid."""
    M, K = x.shape
    N = w.shape[1]
    tm = _row_tile(M)
    return pl.pallas_call(
        functools.partial(_linear_kernel, act=act),
        out_shape=jax.ShapeDtypeStruct((M, N), x.dtype),
        grid=(M // tm,),
        in_specs=[
            pl.BlockSpec((tm, K), lambda i: (i, 0)),
            pl.BlockSpec((K, N), lambda i: (0, 0)),
            pl.BlockSpec((1, N), lambda i: (0, 0)),
        ],
        out_specs=pl.BlockSpec((tm, N), lambda i: (i, 0)),
        compiler_params=pltpu.CompilerParams(
            dimension_semantics=("parallel",)),
    )(x, w, b.reshape(1, N))


def _layernorm_kernel(x_ref, g_ref, b_ref, o_ref, *, eps):
    x = x_ref[...].astype(jnp.float32)
    mu = jnp.mean(x, axis=-1, keepdims=True)
    var = jnp.mean((x - mu) ** 2, axis=-1, keepdims=True)
    y = (x - mu) * jax.lax.rsqrt(var + eps)
    o_ref[...] = (y * g_ref[...] + b_ref[...]).astype(o_ref.dtype)


def pallas_layernorm(x, gamma, beta, eps=1e-5):
    """x: [M, D], gamma/beta: [D] -> [M, D]; row-tiled, parallel grid."""
    M, D = x.shape
    tm = _row_tile(M)
    return pl.pallas_call(
        functools.partial(_layernorm_kernel, eps=eps),
        out_shape=jax.ShapeDtypeStruct((M, D), x.dtype),
        grid=(M // tm,),
        in_specs=[
            pl.BlockSpec((tm, D), lambda i: (i, 0)),
            pl.BlockSpec((1, D), lambda i: (0, 0)),
            pl.BlockSpec((1, D), lambda i: (0, 0)),
        ],
        out_specs=pl.BlockSpec((tm, D), lambda i: (i, 0)),
        compiler_params=pltpu.CompilerParams(
            dimension_semantics=("parallel",)),
    )(x, gamma.reshape(1, D), beta.reshape(1, D))


# ----------------------------------------------------------------------------
# Fused transformer layer kernel (whole pre-norm block in one pallas_call)
# ----------------------------------------------------------------------------
def _fused_layer_kernel(*refs, num_heads, has_bias, scale, eps):
    if has_bias:
        (x_ref, ln1g, ln1b, qkvw, qkvb, projw, projb,
         ln2g, ln2b, fc1w, fc1b, fc2w, fc2b, bias_ref, o_ref) = refs
    else:
        (x_ref, ln1g, ln1b, qkvw, qkvb, projw, projb,
         ln2g, ln2b, fc1w, fc1b, fc2w, fc2b, o_ref) = refs
        bias_ref = None

    x = x_ref[...].astype(jnp.float32)            # [Gb, S, D]
    Gb, S, D = x.shape
    H = num_heads
    Hd = D // H
    F = fc1w.shape[1]

    # ---- attention sub-block (pre-norm) -------------------------------------
    mu = jnp.mean(x, axis=-1, keepdims=True)
    var = jnp.mean((x - mu) ** 2, axis=-1, keepdims=True)
    xn = (x - mu) * jax.lax.rsqrt(var + eps) * ln1g[...] + ln1b[...]

    wqkv = jnp.broadcast_to(qkvw[...], (Gb, D, 3 * D))          # resident weights
    qkv = jnp.einsum('gsd,gdf->gsf', xn, wqkv,
                     preferred_element_type=jnp.float32) + qkvb[...]   # [Gb,S,3D]

    pw = projw[...]                                             # [D, D]
    attn = None
    for h in range(H):                                          # static unroll
        qh = qkv[:, :, h * Hd:(h + 1) * Hd] * scale             # scale folded in
        kh = qkv[:, :, D + h * Hd:D + (h + 1) * Hd]
        vh = qkv[:, :, 2 * D + h * Hd:2 * D + (h + 1) * Hd]
        s = jnp.einsum('gqd,gkd->gqk', qh, kh,
                       preferred_element_type=jnp.float32)       # [Gb, S, S]
        if has_bias:
            s = s + bias_ref[h][None, :, :]                      # [H,S,S] bias
        m = jnp.max(s, axis=-1, keepdims=True)
        p = jnp.exp(s - m)
        p = p * pl.reciprocal(jnp.sum(p, axis=-1, keepdims=True), approx=True)
        oh = jnp.einsum('gqk,gkd->gqd', p, vh,
                        preferred_element_type=jnp.float32)      # [Gb, S, Hd]
        # per-head slice of the output projection (row offsets are multiples of 8)
        pwh = jnp.broadcast_to(pw[h * Hd:(h + 1) * Hd, :], (Gb, Hd, D))
        contrib = jnp.einsum('gsd,gdf->gsf', oh, pwh,
                             preferred_element_type=jnp.float32)
        attn = contrib if attn is None else attn + contrib
    x = x + attn + projb[...]

    # ---- MLP sub-block (pre-norm) --------------------------------------------
    mu2 = jnp.mean(x, axis=-1, keepdims=True)
    var2 = jnp.mean((x - mu2) ** 2, axis=-1, keepdims=True)
    xn2 = (x - mu2) * jax.lax.rsqrt(var2 + eps) * ln2g[...] + ln2b[...]

    w1 = jnp.broadcast_to(fc1w[...], (Gb, D, F))
    h1 = jnp.einsum('gsd,gdf->gsf', xn2, w1,
                    preferred_element_type=jnp.float32) + fc1b[...]
    # TODO(synk): PyTorch nn.GELU defaults to exact erf; tanh approximation used.
    h1 = jax.nn.gelu(h1, approximate=True)
    w2 = jnp.broadcast_to(fc2w[...], (Gb, F, D))
    y = jnp.einsum('gsd,gdf->gsf', h1, w2,
                   preferred_element_type=jnp.float32) + fc2b[...]
    o_ref[...] = (x + y).astype(o_ref.dtype)


def fused_transformer_layer(x, lp, num_heads, bias=None, eps=1e-5):
    """One pre-norm transformer block fused into one pallas_call.
    x: [Bseq, S, D]; bias: None or [H, S, S] additive attention bias."""
    Bseq, S, D = x.shape
    Hd = D // num_heads
    scale = 1.0 / math.sqrt(Hd)
    Gb = _seq_tile(Bseq)

    weights = [
        lp["ln1_g"].reshape(1, D), lp["ln1_b"].reshape(1, D),
        lp["qkv_w"], lp["qkv_b"].reshape(1, -1),
        lp["proj_w"], lp["proj_b"].reshape(1, -1),
        lp["ln2_g"].reshape(1, D), lp["ln2_b"].reshape(1, D),
        lp["fc1_w"], lp["fc1_b"].reshape(1, -1),
        lp["fc2_w"], lp["fc2_b"].reshape(1, -1),
    ]
    in_specs = [pl.BlockSpec((Gb, S, D), lambda g: (g, 0, 0))]
    in_specs += [pl.BlockSpec(w.shape, lambda g: (0, 0)) for w in weights]
    args = [x] + weights
    if bias is not None:
        in_specs.append(pl.BlockSpec(bias.shape, lambda g: (0, 0, 0)))
        args.append(bias)

    kernel = functools.partial(
        _fused_layer_kernel, num_heads=num_heads,
        has_bias=bias is not None, scale=scale, eps=eps)

    return pl.pallas_call(
        kernel,
        out_shape=jax.ShapeDtypeStruct(x.shape, x.dtype),
        grid=(Bseq // Gb,),
        in_specs=in_specs,
        out_specs=pl.BlockSpec((Gb, S, D), lambda g: (g, 0, 0)),
        compiler_params=pltpu.CompilerParams(
            dimension_semantics=("parallel",)),
    )(*args)


# ----------------------------------------------------------------------------
# Parameter init (deterministic, synthetic)
# ----------------------------------------------------------------------------
def _init_linear(key, fan_in, fan_out):
    w = jax.random.normal(key, (fan_in, fan_out), jnp.float32) / np.sqrt(fan_in)
    b = jnp.zeros((fan_out,), jnp.float32)
    return w, b


def _init_block(key, D, mlp_ratio):
    ks = jax.random.split(key, 4)
    qkv_w, qkv_b = _init_linear(ks[0], D, 3 * D)
    proj_w, proj_b = _init_linear(ks[1], D, D)
    fc1_w, fc1_b = _init_linear(ks[2], D, mlp_ratio * D)
    fc2_w, fc2_b = _init_linear(ks[3], mlp_ratio * D, D)
    return dict(
        ln1_g=jnp.ones((D,), jnp.float32), ln1_b=jnp.zeros((D,), jnp.float32),
        ln2_g=jnp.ones((D,), jnp.float32), ln2_b=jnp.zeros((D,), jnp.float32),
        qkv_w=qkv_w, qkv_b=qkv_b, proj_w=proj_w, proj_b=proj_b,
        fc1_w=fc1_w, fc1_b=fc1_b, fc2_w=fc2_w, fc2_b=fc2_b,
    )


def init_stg_encoder_params(key, cfg, num_patches):
    D = cfg["embed_dim"]
    H = cfg["num_heads"]
    depth = cfg["encoder_depth"]
    mlp_ratio = cfg["mlp_ratio"]
    k_t, k_s, k_f, k_feat, k_pos, k_in, k_out, k_sp, k_fuse, k_mask = jax.random.split(key, 10)

    feat_w, feat_b = _init_linear(k_feat, 2, D)
    t_params = dict(
        feat_w=feat_w, feat_b=feat_b,
        pos_emb=0.02 * jax.random.normal(k_pos, (num_patches, D), jnp.float32),
        layers=[_init_block(k, D, mlp_ratio) for k in jax.random.split(k_t, depth)],
        lnf_g=jnp.ones((D,), jnp.float32), lnf_b=jnp.zeros((D,), jnp.float32),
    )
    s_params = dict(
        in_deg_emb=0.02 * jax.random.normal(k_in, (cfg["num_in_degree"], D), jnp.float32),
        out_deg_emb=0.02 * jax.random.normal(k_out, (cfg["num_out_degree"], D), jnp.float32),
        spatial_emb=0.02 * jax.random.normal(k_sp, (cfg["num_spatial"], H), jnp.float32),
        layers=[_init_block(k, D, mlp_ratio) for k in jax.random.split(k_s, depth)],
        lnf_g=jnp.ones((D,), jnp.float32), lnf_b=jnp.zeros((D,), jnp.float32),
    )
    fuse_w, fuse_b = _init_linear(k_fuse, 2 * D, D)
    f_params = dict(
        fuse_w=fuse_w, fuse_b=fuse_b,
        mask_token=0.02 * jax.random.normal(k_mask, (D,), jnp.float32),
    )
    return dict(t=t_params, s=s_params, f=f_params)


# ----------------------------------------------------------------------------
# Sub-encoders (glue around the Pallas kernels)
# ----------------------------------------------------------------------------
def mask_generator(length, mask_ratio, rng):
    perm = rng.permutation(length)
    num_keep = max(1, int(length * (1.0 - mask_ratio)))
    uti = sorted(perm[:num_keep].tolist())
    mti = sorted(perm[num_keep:].tolist())
    return uti, mti


def tsformer_encoder(params, patches, feat, num_heads, t_uti):
    """Temporal transformer encoder over unmasked temporal patches."""
    B, Nn, P, D = patches.shape
    feat_emb = pallas_linear(feat.reshape(-1, 2), params["feat_w"], params["feat_b"])
    x = patches + feat_emb.reshape(B, Nn, P, D) + params["pos_emb"][None, None]
    if t_uti is not None:
        x = x[:, :, np.asarray(t_uti, dtype=np.int32)]
    Pu = x.shape[2]
    x = x.reshape(B * Nn, Pu, D)
    for lp in params["layers"]:
        x = fused_transformer_layer(x, lp, num_heads, bias=None)
    x = pallas_layernorm(x.reshape(-1, D), params["lnf_g"], params["lnf_b"])
    return x.reshape(B, Nn, Pu, D)


def graphormer_encoder(params, patches, in_degree, out_degree, spatial_pos, num_heads, s_uti):
    """Spatial (node-axis) transformer encoder with degree + spatial bias."""
    B, Nn, Pu, D = patches.shape
    node_emb = params["in_deg_emb"][in_degree] + params["out_deg_emb"][out_degree]  # [N, D]
    x = patches + node_emb[None, :, None, :]
    bias_full = params["spatial_emb"][spatial_pos]  # [N, N, H]
    if s_uti is not None:
        idx = np.asarray(s_uti, dtype=np.int32)
        x = x[:, idx]
        bias_full = bias_full[idx][:, idx]
        Nn = len(s_uti)
    # sequence axis = nodes; one sequence per (batch, temporal patch)
    x = x.transpose(0, 2, 1, 3).reshape(B * Pu, Nn, D)
    bias = jnp.transpose(bias_full, (2, 0, 1)).astype(jnp.float32)  # [H, Nn, Nn]
    for lp in params["layers"]:
        x = fused_transformer_layer(x, lp, num_heads, bias=bias)
    x = pallas_layernorm(x.reshape(-1, D), params["lnf_g"], params["lnf_b"])
    x = x.reshape(B, Pu, Nn, D)
    return x.transpose(0, 2, 1, 3)  # [B, Nn, Pu, D]


def encoder_fusion(params, t_patches, t_mti, t_uti, s_patches, s_mti, s_uti, full_shape):
    """Fuse temporal/spatial tokens and scatter into a mask-token canvas."""
    B, N, P, D = full_shape
    concat = jnp.concatenate([t_patches, s_patches], axis=-1)  # [B, Nu, Pu, 2D]
    fused = pallas_linear(concat.reshape(-1, 2 * D), params["fuse_w"], params["fuse_b"])
    fused = fused.reshape(t_patches.shape)
    full = jnp.broadcast_to(params["mask_token"][None, None, None, :], (B, N, P, D))
    s_idx = np.asarray(s_uti if s_uti is not None else np.arange(N), dtype=np.int32)
    t_idx = np.asarray(t_uti if t_uti is not None else np.arange(P), dtype=np.int32)
    full = full.at[:, s_idx[:, None], t_idx[None, :], :].set(fused)
    return full


# ----------------------------------------------------------------------------
# STGEncoder forward
# ----------------------------------------------------------------------------
def stg_encoder_forward(params, cfg, patches, spatial_pos, in_degree, out_degree,
                        feat_patch, sprompter=None, tprompter=None,
                        random_mask=True, task=None, mask_rng=None, **kwargs):
    if task is not None:
        assert random_mask is False
    B, N, P, D = patches.shape
    num_heads = cfg["num_heads"]
    t_uti, t_mti, s_uti, s_mti = None, None, None, None
    if random_mask:
        rng = mask_rng if mask_rng is not None else np.random.RandomState(0)
        t_uti, t_mti = mask_generator(P, cfg["mask_ratio"], rng)
        s_uti, s_mti = mask_generator(N, cfg["mask_ratio"], rng)
    else:
        if task in ["forecasting", "extrapolation"]:
            his_num = cfg["task"]["forecasting"]["history_patch"]
            fu_num = cfg["task"]["forecasting"]["future_patch"] + his_num
            assert fu_num == cfg["task"]["num_patch"]
            t_uti = list(range(his_num))
            t_mti = list(range(his_num, fu_num))
        if task in ["kriging", "extrapolation"]:
            s_uti = kwargs["s_uti"]
            s_mti = kwargs["s_mti"]

    # TODO(synk): sprompter / tprompter hooks are not defined in the reference
    # snippet; they are passed through as None and ignored here.

    if s_uti is not None:
        s_sel = np.asarray(s_uti, dtype=np.int32)
        t_patches_in, t_feat = patches[:, s_sel], feat_patch[:, s_sel]
    else:
        t_patches_in, t_feat = patches, feat_patch

    t_out = tsformer_encoder(params["t"], t_patches_in, t_feat, num_heads, t_uti)

    if t_uti is not None:
        s_patches_in = patches[:, :, np.asarray(t_uti, dtype=np.int32)]
    else:
        s_patches_in = patches

    s_out = graphormer_encoder(params["s"], s_patches_in, in_degree, out_degree,
                               spatial_pos, num_heads, s_uti)

    full_patches = encoder_fusion(params["f"], t_out, t_mti, t_uti,
                                  s_out, s_mti, s_uti, (B, N, P, D))
    return full_patches, t_uti, t_mti, s_uti, s_mti


# ----------------------------------------------------------------------------
# Main
# ----------------------------------------------------------------------------
if __name__ == "__main__":
    cfg = dict(
        embed_dim=32,
        num_heads=4,
        mlp_ratio=2,
        mask_ratio=0.5,
        encoder_depth=2,
        dropout=0.0,          # eval mode: dropout is a no-op
        num_in_degree=16,
        num_out_degree=16,
        num_spatial=16,
    )
    B, N, P, D = 2, 8, 8, cfg["embed_dim"]

    key = jax.random.PRNGKey(0)
    k_par, k_x, k_sp, k_in, k_out, k_feat = jax.random.split(key, 6)

    params = init_stg_encoder_params(k_par, cfg, num_patches=P)

    patches = jax.random.normal(k_x, (B, N, P, D), jnp.float32)
    spatial_pos = jax.random.randint(k_sp, (N, N), 0, cfg["num_spatial"], jnp.int32)
    in_degree = jax.random.randint(k_in, (N,), 0, cfg["num_in_degree"], jnp.int32)
    out_degree = jax.random.randint(k_out, (N,), 0, cfg["num_out_degree"], jnp.int32)
    feat_patch = jax.random.normal(k_feat, (B, N, P, 2), jnp.float32)

    full_patches, t_uti, t_mti, s_uti, s_mti = stg_encoder_forward(
        params, cfg, patches, spatial_pos, in_degree, out_degree, feat_patch,
        random_mask=True,
    )
    full_patches = jax.block_until_ready(full_patches)
    assert full_patches.shape == (B, N, P, D)
    assert jnp.all(jnp.isfinite(full_patches))
    print("KERNEL_OK")
</pallas_src>

<mosaic_0001>
module attributes {stable_mosaic.version = 11 : i64} {
  func.func @_linear_kernel(%arg0: i32, %arg1: memref<32x2xf32, #tpu.memory_space<vmem>>, %arg2: memref<2x32xf32, #tpu.memory_space<vmem>>, %arg3: memref<1x32xf32, #tpu.memory_space<vmem>>, %arg4: memref<32x32xf32, #tpu.memory_space<vmem>>) attributes {dimension_semantics = [#tpu.dimension_semantics<parallel>], iteration_bounds = array<i64: 2>, scalar_prefetch = 0 : i64, scratch_operands = 0 : i64, tpu.core_type = #tpu.core_type<tc>, window_params = [{transform_indices = @transform_0, window_bounds = array<i64: 32, 2>}, {pipeline_mode = #tpu.pipeline_mode<synchronous>, transform_indices = @transform_1, window_bounds = array<i64: 2, 32>}, {pipeline_mode = #tpu.pipeline_mode<synchronous>, transform_indices = @transform_2, window_bounds = array<i64: 1, 32>}, {transform_indices = @transform_3, window_bounds = array<i64: 32, 32>}]} {
    %c0 = arith.constant 0 : index
    %c0_0 = arith.constant 0 : index
    %0 = vector.load %arg1[%c0, %c0_0] : memref<32x2xf32, #tpu.memory_space<vmem>>, vector<32x2xf32>
    %c0_1 = arith.constant 0 : index
    %c0_2 = arith.constant 0 : index
    %1 = vector.load %arg2[%c0_1, %c0_2] : memref<2x32xf32, #tpu.memory_space<vmem>>, vector<2x32xf32>
    %cst = arith.constant dense<0.000000e+00> : vector<32x32xf32>
    %2 = tpu.matmul %0, %1, %cst {dimension_numbers = #tpu.dot_dimension_numbers<[1], [0], [0], [1], [0, 0, 1, 1], [], []>} : vector<32x2xf32>, vector<2x32xf32>, vector<32x32xf32> -> vector<32x32xf32>
    %c0_3 = arith.constant 0 : index
    %c0_4 = arith.constant 0 : index
    %3 = vector.load %arg3[%c0_3, %c0_4] : memref<1x32xf32, #tpu.memory_space<vmem>>, vector<1x32xf32>
    %4 = vector.broadcast %3 : vector<1x32xf32> to vector<32x32xf32>
    %5 = arith.addf %2, %4 : vector<32x32xf32>
    %c0_5 = arith.constant 0 : index
    %c0_6 = arith.constant 0 : index
    %6 = vector.load %arg4[%c0_5, %c0_6] : memref<32x32xf32, #tpu.memory_space<vmem>>, vector<32x32xf32>
    tpu.vector_store %arg4[%c0_5, %c0_6], %5 {strides = array<i32>} : memref<32x32xf32, #tpu.memory_space<vmem>>, vector<32x32xf32>,
    return
  }
  func.func @transform_0(%arg0: i32) -> (i32, i32) {
    %c0_i32 = arith.constant 0 : i32
    %c0_i32_0 = arith.constant 0 : i32
    return %arg0, %c0_i32 : i32, i32
  }
  func.func @transform_1(%arg0: i32) -> (i32, i32) {
    %c0_i32 = arith.constant 0 : i32
    %c0_i32_0 = arith.constant 0 : i32
    %c0_i32_1 = arith.constant 0 : i32
    return %c0_i32, %c0_i32_0 : i32, i32
  }
  func.func @transform_2(%arg0: i32) -> (i32, i32) {
    %c0_i32 = arith.constant 0 : i32
    %c0_i32_0 = arith.constant 0 : i32
    %c0_i32_1 = arith.constant 0 : i32
    return %c0_i32, %c0_i32_0 : i32, i32
  }
  func.func @transform_3(%arg0: i32) -> (i32, i32) {
    %c0_i32 = arith.constant 0 : i32
    %c0_i32_0 = arith.constant 0 : i32
    return %arg0, %c0_i32 : i32, i32
  }
}

</mosaic_0001>

<bundles_post_ra>
// kernel: tpu_custom_call.1
= control target key start
LH: loop header
LB: loop body
LE: loop exit
PB: predicated region body
PF: predicated region fallthrough
CT: control target
= control target key end

     0   :  { %s417_s12 = smov 0   ;;  %s440_s0 = inlined_call_operand.vmem [shape: f32[64,2], index: 0, kind: input, shape index: {}]   ;;  %s441_s1 = inlined_call_operand.vmem [shape: f32[2,32], index: 1, kind: input, shape index: {}]   ;;  %s442_s2 = inlined_call_operand.vmem [shape: f32[1,32], index: 2, kind: input, shape index: {}]   ;;  %s443_s3 = inlined_call_operand.vmem [shape: f32[64,32], index: 3, kind: output, shape index: {}]  }
   0x1 LB: > { %s349_s13 = sadd.s32 4294967295, %s395_s12   ;;  %p353_p0 = scmp.ge.s32.totalorder %s395_s12, 1  ;;  %s395_s12 = sphi %s417_s12, %s13_s12  }
   0x2   : > { %p138_p1 = scmp.lt.s32.totalorder %s395_s12, 3 }
   0x4   : > { %p139_p2 = pnand %p353_p0, %p138_p1 }
   0x5   : > { %v178_v0 = vld [vmem:[%s441_s1] sm:$0x3] (!%p139_p2)  ;;  %vm199_vm0 = vcmask (!%p139_p2), 1041408   ;;  %s354_s16 = sshll.u32 (!%p139_p2), %s349_s13, 2  ;;  %vm186_vm1 = vcmask (!%p139_p2), 15360   ;;  %vm288_vm2 = vcmask (!%p139_p2), 261120  }
   0x6   : > { %142 = sbr.rel (%p139_p2) target bundleno = 234 (0xea), region = 32  ;;  %371 = vmatprep.subr.msk.mxu0 (!%p139_p2), %vm199_vm0, %v178_v0  ;;  %379 = vmatprep.subr.msk.mxu1 (!%p139_p2), %vm199_vm0, %v178_v0  ;;  %p163_p3 = scmp.lt.s32.totalorder (!%p139_p2), %s354_s16, 7  ;;  %v358_v5 = vld [vmem:[%s442_s2] ss:$0 sm:$0xff] (!%p139_p2) }
   0x7   : > { %372 = vmatpush3.msk.msra.mxu0 (!%p139_p2), %vm199_vm0, %v178_v0  ;;  %380 = vmatpush3.msk.msra.mxu1 (!%p139_p2), %vm199_vm0, %v178_v0 }
   0xd   : > { %s445_s16 = smov (!%p163_p3, %s354_s16), 7 }
   0xe   : > { %s355_s17 = sshll.u32 %s445_s16, 3 }
   0xf   : > { %s166_s20 = scalar_lea.vmem %s440_s0, %s355_s17  ;;  %s172_s25 = scalar_lea.vmem %s443_s3, %s355_s17 }
  0x10   : > { %v174_v1 = vld [vmem:[%s166_s20] sm:$0xff]  ;;  %v175_v2 = vld [vmem:[%s166_s20 + $0x8] sm:$0xff]  ;;  %v176_v3 = vld [vmem:[%s166_s20 + $0x10] sm:$0xff] }
  0x11   : > { %373 = vmatprep.mubr.msk.f32.mxu0 %vm186_vm1, %v174_v1  ;;  %376 = vmatprep.mubr.msk.f32.mxu1 %vm186_vm1, %v176_v3  ;;  %v177_v4 = vld [vmem:[%s166_s20 + $0x18] sm:$0xff] }
  0x12   : > { %374 = vmatmul.mubr.msk.f32.vlgmr.msra.gmra.mrb[0].mxu0 %vm186_vm1, %v175_v2  ;;  %377 = vmatmul.mubr.msk.f32.vlgmr.msra.gmra.mrb[0].mxu1 %vm186_vm1, %v177_v4 }
  0xe5   : > { %v375_v6 = vpop.f32.mrb[0].mxu0  ;;  %v378_v7 = vpop.f32.mrb[0].mxu1 }
  0xe6   : > { %v269_v8 = vpop.f32.mrb[1].mxu0  ;;  %v279_v9 = vpop.f32.mrb[1].mxu1  ;;  %v275_v12 = vadd.f32 %v375_v6, %v358_v5  ;;  %v285_v13 = vadd.f32 %v378_v7, %v358_v5 }
  0xe7   : > { %v270_v10 = vadd.f32 %v358_v5, %v269_v8  ;;  %v280_v11 = vadd.f32 %v358_v5, %v279_v9 }
  0xe8   : > { %290 = vst.msk [vmem:[%s172_s25 + $0x8] sm:$0xff] %vm288_vm2, %v275_v12  ;;  %292 = vst.msk [vmem:[%s172_s25 + $0x18] sm:$0xff] %vm288_vm2, %v285_v13 }
  0xe9   : > { %289 = vst.msk [vmem:[%s172_s25] sm:$0xff] %vm288_vm2, %v270_v10  ;;  %291 = vst.msk [vmem:[%s172_s25 + $0x10] sm:$0xff] %vm288_vm2, %v280_v11 }
  0xea PF: > { %s13_s12 = sadd.s32 1, %s395_s12  }
  0xeb   : > { %p10_p4 = scmp.ge.s32.totalorder %s13_s12, 4  }
  0xed   :  { %12 = sbr.rel (!%p10_p4) target bundleno = 1 (0x1), region = 62 }

</bundles_post_ra>
